<compile_context>
chip_gen: v6e
topology: v6e:2x2x1
jax: 0.10.0
libtpu: 0.0.40
codegen_flags: <defaults>
</compile_context>

<pallas_src>
import functools

import jax
import jax.numpy as jnp
from jax.experimental import pallas as pl
from jax.experimental.pallas import tpu as pltpu


def _se_kernel(x_ref, w1t_ref, b1_ref, w2t_ref, b2_ref, o_ref, *, inv_hw):
    # x_ref: (Nb, C, HWp)   w1t: (C, Cmid)   b1: (1, Cmid)
    # w2t:   (Cmid, C)      b2:  (1, C)      o_ref: (Nb, C, HWp)
    x = x_ref[...]

    # Squeeze: global average pool over the (padded) spatial axis.
    # Padding is zeros, so the padded sum equals the true sum; divide by the
    # true HW.  Accumulate in f32 (important for bf16 activations).
    xm = jnp.sum(x.astype(jnp.float32), axis=-1) * inv_hw            # (Nb, C)

    # Excite: 1x1 conv -> SiLU -> 1x1 conv -> Sigmoid, as Nb-wide matmuls.
    h = jnp.dot(xm, w1t_ref[...], preferred_element_type=jnp.float32)
    h = h + b1_ref[...]                                              # (Nb, Cmid)
    h = h * jax.nn.sigmoid(h)                                        # SiLU
    g = jnp.dot(h, w2t_ref[...], preferred_element_type=jnp.float32)
    g = jax.nn.sigmoid(g + b2_ref[...])                              # (Nb, C)

    # Scale (broadcast the per-(n, c) gate over the spatial axis).
    o_ref[...] = (x.astype(jnp.float32) * g[:, :, None]).astype(o_ref.dtype)


def se_forward(x_nchw, w1, b1, w2, b2, *, nb=None,
               block_target_bytes=2 * 1024 * 1024):
    """SE forward.  x_nchw: (N, C, H, W); w1: (Cmid, C); b1: (Cmid,);
    w2: (C, Cmid); b2: (C,).  `nb` optionally forces the per-step batch."""
    N, C, H, W = x_nchw.shape
    Cmid = w1.shape[0]
    HW = H * W
    HWp = ((HW + 127) // 128) * 128          # lane-dense last dim

    dtype = x_nchw.dtype
    itemsize = jnp.dtype(dtype).itemsize
    per_image_bytes = C * HWp * itemsize

    # Pick Nb: ~block_target_bytes per block, but keep >= 2 grid steps when
    # N >= 2 so both v7x TensorCores get work (no-op on 1-TC v5e/v6e).
    if nb is None:
        Nb = max(1, block_target_bytes // per_image_bytes)
        if N >= 2:
            Nb = min(Nb, N // 2)
        Nb = max(1, min(Nb, N))
    else:
        Nb = max(1, int(nb))

    n_steps = pl.cdiv(N, Nb)
    Np = n_steps * Nb

    # Flatten spatial dims; pad HW to a multiple of 128 and N to a multiple
    # of Nb (zeros: padded rows/lanes are sliced off and never pollute the
    # true mean).
    x = x_nchw.reshape(N, C, HW)
    pad_n, pad_hw = Np - N, HWp - HW
    if pad_n or pad_hw:
        x = jnp.pad(x, ((0, pad_n), (0, 0), (0, pad_hw)))

    # Pre-transpose the 1x1-conv weights so the kernel does row-major matmuls
    # without any in-kernel transpose.
    w1t = jnp.asarray(w1).T                  # (C, Cmid)
    w2t = jnp.asarray(w2).T                  # (Cmid, C)
    b1r = jnp.asarray(b1).reshape(1, Cmid)
    b2r = jnp.asarray(b2).reshape(1, C)

    block_bytes = Nb * C * HWp * itemsize
    weight_bytes = (2 * C * Cmid + C + Cmid) * 4
    # in + out blocks are each double-buffered -> ~4x block bytes live.
    needed = 4 * block_bytes + 4 * weight_bytes + 4 * 1024 * 1024
    vmem_limit = int(min(100 * 1024 * 1024, max(16 * 1024 * 1024, needed)))

    cost = pl.CostEstimate(
        flops=int(2 * N * C * Cmid * 2 + 2 * N * C * HW),
        transcendentals=int(N * (C + Cmid)),
        bytes_accessed=int(2 * N * C * HW * itemsize + weight_bytes),
    )

    kernel = functools.partial(_se_kernel, inv_hw=1.0 / HW)

    out = pl.pallas_call(
        kernel,
        out_shape=jax.ShapeDtypeStruct((Np, C, HWp), dtype),
        grid=(n_steps,),
        in_specs=[
            pl.BlockSpec((Nb, C, HWp), lambda n: (n, 0, 0)),
            pl.BlockSpec((C, Cmid), lambda n: (0, 0)),
            pl.BlockSpec((1, Cmid), lambda n: (0, 0)),
            pl.BlockSpec((Cmid, C), lambda n: (0, 0)),
            pl.BlockSpec((1, C), lambda n: (0, 0)),
        ],
        out_specs=pl.BlockSpec((Nb, C, HWp), lambda n: (n, 0, 0)),
        compiler_params=pltpu.CompilerParams(
            dimension_semantics=("parallel",),
            vmem_limit_bytes=vmem_limit,
        ),
        cost_estimate=cost,
    )(x, w1t, b1r, w2t, b2r)

    return out[:N, :, :HW].reshape(N, C, H, W)


def se_reference(x_nchw, w1, b1, w2, b2):
    """Pure-JAX reference matching the PyTorch forward."""
    xm = jnp.mean(x_nchw.astype(jnp.float32), axis=(2, 3))   # (N, C)
    h = xm @ w1.T + b1                                       # (N, Cmid)
    h = h * jax.nn.sigmoid(h)                                # SiLU
    g = jax.nn.sigmoid(h @ w2.T + b2)                        # (N, C)
    return (x_nchw.astype(jnp.float32) * g[:, :, None, None]).astype(x_nchw.dtype)


def _make_case(key, N, C, H, W, r):
    Cmid = C // (4 * r)
    kx, k1, k2, k3, k4 = jax.random.split(key, 5)
    x = jax.random.normal(kx, (N, C, H, W), dtype=jnp.float32)
    w1 = jax.random.normal(k1, (Cmid, C), dtype=jnp.float32) * 0.1
    b1 = jax.random.normal(k2, (Cmid,), dtype=jnp.float32) * 0.1
    w2 = jax.random.normal(k3, (C, Cmid), dtype=jnp.float32) * 0.1
    b2 = jax.random.normal(k4, (C,), dtype=jnp.float32) * 0.1
    return x, w1, b1, w2, b2


if __name__ == "__main__":
    keys = jax.random.split(jax.random.PRNGKey(0), 3)

    # Case 1: SE(ch=32, r=1), HW = 16*16 = 256 (already lane-aligned).
    x, w1, b1, w2, b2 = _make_case(keys[0], 2, 32, 16, 16, 1)
    out = se_forward(x, w1, b1, w2, b2)
    jax.block_until_ready(out)
    ref = se_reference(x, w1, b1, w2, b2)
    assert out.shape == x.shape
    assert jnp.allclose(out, ref, atol=1e-5, rtol=1e-5), "case1 mismatch"

    # Case 2: HW = 7*7 = 49 -> exercises zero-padding of the lane axis to 128.
    x, w1, b1, w2, b2 = _make_case(keys[1], 3, 32, 7, 7, 1)
    out = se_forward(x, w1, b1, w2, b2)
    jax.block_until_ready(out)
    ref = se_reference(x, w1, b1, w2, b2)
    assert jnp.allclose(out, ref, atol=1e-5, rtol=1e-5), "case2 mismatch"

    # Case 3: N = 5 with forced Nb = 2 -> exercises batch padding (Np = 6).
    x, w1, b1, w2, b2 = _make_case(keys[2], 5, 32, 14, 14, 1)
    out = se_forward(x, w1, b1, w2, b2, nb=2)
    jax.block_until_ready(out)
    ref = se_reference(x, w1, b1, w2, b2)
    assert jnp.allclose(out, ref, atol=1e-5, rtol=1e-5), "case3 mismatch"

    print("KERNEL_OK")
</pallas_src>

<mosaic_0001>
module attributes {stable_mosaic.version = 11 : i64} {
  func.func @_se_kernel(%arg0: i32, %arg1: memref<1x32x256xf32, #tpu.memory_space<vmem>>, %arg2: memref<32x8xf32, #tpu.memory_space<vmem>>, %arg3: memref<1x8xf32, #tpu.memory_space<vmem>>, %arg4: memref<8x32xf32, #tpu.memory_space<vmem>>, %arg5: memref<1x32xf32, #tpu.memory_space<vmem>>, %arg6: memref<1x32x256xf32, #tpu.memory_space<vmem>>) attributes {dimension_semantics = [#tpu.dimension_semantics<parallel>], iteration_bounds = array<i64: 2>, scalar_prefetch = 0 : i64, scratch_operands = 0 : i64, tpu.core_type = #tpu.core_type<tc>, window_params = [{transform_indices = @transform_0, window_bounds = array<i64: 1, 32, 256>}, {pipeline_mode = #tpu.pipeline_mode<synchronous>, transform_indices = @transform_1, window_bounds = array<i64: 32, 8>}, {pipeline_mode = #tpu.pipeline_mode<synchronous>, transform_indices = @transform_2, window_bounds = array<i64: 1, 8>}, {pipeline_mode = #tpu.pipeline_mode<synchronous>, transform_indices = @transform_3, window_bounds = array<i64: 8, 32>}, {pipeline_mode = #tpu.pipeline_mode<synchronous>, transform_indices = @transform_4, window_bounds = array<i64: 1, 32>}, {transform_indices = @transform_5, window_bounds = array<i64: 1, 32, 256>}]} {
    %c0 = arith.constant 0 : index
    %c0_0 = arith.constant 0 : index
    %c0_1 = arith.constant 0 : index
    %0 = vector.load %arg1[%c0, %c0_0, %c0_1] : memref<1x32x256xf32, #tpu.memory_space<vmem>>, vector<1x32x256xf32>
    %cst = arith.constant dense<0.000000e+00> : vector<1x32xf32>
    %1 = vector.multi_reduction <add>, %0, %cst [2] : vector<1x32x256xf32> to vector<1x32xf32>
    %cst_2 = arith.constant 3.906250e-03 : f32
    %2 = vector.broadcast %cst_2 : f32 to vector<1x32xf32>
    %3 = arith.mulf %1, %2 : vector<1x32xf32>
    %c0_3 = arith.constant 0 : index
    %c0_4 = arith.constant 0 : index
    %4 = vector.load %arg2[%c0_3, %c0_4] : memref<32x8xf32, #tpu.memory_space<vmem>>, vector<32x8xf32>
    %cst_5 = arith.constant dense<0.000000e+00> : vector<1x8xf32>
    %5 = tpu.matmul %3, %4, %cst_5 {dimension_numbers = #tpu.dot_dimension_numbers<[1], [0], [0], [1], [0, 0, 1, 1], [], []>} : vector<1x32xf32>, vector<32x8xf32>, vector<1x8xf32> -> vector<1x8xf32>
    %c0_6 = arith.constant 0 : index
    %c0_7 = arith.constant 0 : index
    %6 = vector.load %arg3[%c0_6, %c0_7] : memref<1x8xf32, #tpu.memory_space<vmem>>, vector<1x8xf32>
    %7 = arith.addf %5, %6 : vector<1x8xf32>
    %8 = arith.negf %7 : vector<1x8xf32>
    %9 = math.exp %8 : vector<1x8xf32>
    %cst_8 = arith.constant 1.000000e+00 : f32
    %10 = vector.broadcast %cst_8 : f32 to vector<1x8xf32>
    %11 = arith.addf %10, %9 : vector<1x8xf32>
    %12 = arith.divf %10, %11 : vector<1x8xf32>
    %13 = arith.mulf %7, %12 : vector<1x8xf32>
    %c0_9 = arith.constant 0 : index
    %c0_10 = arith.constant 0 : index
    %14 = vector.load %arg4[%c0_9, %c0_10] : memref<8x32xf32, #tpu.memory_space<vmem>>, vector<8x32xf32>
    %cst_11 = arith.constant dense<0.000000e+00> : vector<1x32xf32>
    %15 = tpu.matmul %13, %14, %cst_11 {dimension_numbers = #tpu.dot_dimension_numbers<[1], [0], [0], [1], [0, 0, 1, 1], [], []>} : vector<1x8xf32>, vector<8x32xf32>, vector<1x32xf32> -> vector<1x32xf32>
    %c0_12 = arith.constant 0 : index
    %c0_13 = arith.constant 0 : index
    %16 = vector.load %arg5[%c0_12, %c0_13] : memref<1x32xf32, #tpu.memory_space<vmem>>, vector<1x32xf32>
    %17 = arith.addf %15, %16 : vector<1x32xf32>
    %18 = arith.negf %17 : vector<1x32xf32>
    %19 = math.exp %18 : vector<1x32xf32>
    %cst_14 = arith.constant 1.000000e+00 : f32
    %20 = vector.broadcast %cst_14 : f32 to vector<1x32xf32>
    %21 = arith.addf %20, %19 : vector<1x32xf32>
    %22 = arith.divf %20, %21 : vector<1x32xf32>
    %23 = vector.shape_cast %22 : vector<1x32xf32> to vector<1x32x1xf32>
    %24 = vector.broadcast %23 : vector<1x32x1xf32> to vector<1x32x256xf32>
    %25 = arith.mulf %0, %24 : vector<1x32x256xf32>
    %c0_15 = arith.constant 0 : index
    %c0_16 = arith.constant 0 : index
    %c0_17 = arith.constant 0 : index
    %26 = vector.load %arg6[%c0_15, %c0_16, %c0_17] : memref<1x32x256xf32, #tpu.memory_space<vmem>>, vector<1x32x256xf32>
    tpu.vector_store %arg6[%c0_15, %c0_16, %c0_17], %25 {strides = array<i32>} : memref<1x32x256xf32, #tpu.memory_space<vmem>>, vector<1x32x256xf32>,
    return
  }
  func.func @transform_0(%arg0: i32) -> (i32, i32, i32) {
    %c0_i32 = arith.constant 0 : i32
    %c0_i32_0 = arith.constant 0 : i32
    %c0_i32_1 = arith.constant 0 : i32
    return %arg0, %c0_i32, %c0_i32_0 : i32, i32, i32
  }
  func.func @transform_1(%arg0: i32) -> (i32, i32) {
    %c0_i32 = arith.constant 0 : i32
    %c0_i32_0 = arith.constant 0 : i32
    %c0_i32_1 = arith.constant 0 : i32
    return %c0_i32, %c0_i32_0 : i32, i32
  }
  func.func @transform_2(%arg0: i32) -> (i32, i32) {
    %c0_i32 = arith.constant 0 : i32
    %c0_i32_0 = arith.constant 0 : i32
    %c0_i32_1 = arith.constant 0 : i32
    return %c0_i32, %c0_i32_0 : i32, i32
  }
  func.func @transform_3(%arg0: i32) -> (i32, i32) {
    %c0_i32 = arith.constant 0 : i32
    %c0_i32_0 = arith.constant 0 : i32
    %c0_i32_1 = arith.constant 0 : i32
    return %c0_i32, %c0_i32_0 : i32, i32
  }
  func.func @transform_4(%arg0: i32) -> (i32, i32) {
    %c0_i32 = arith.constant 0 : i32
    %c0_i32_0 = arith.constant 0 : i32
    %c0_i32_1 = arith.constant 0 : i32
    return %c0_i32, %c0_i32_0 : i32, i32
  }
  func.func @transform_5(%arg0: i32) -> (i32, i32, i32) {
    %c0_i32 = arith.constant 0 : i32
    %c0_i32_0 = arith.constant 0 : i32
    %c0_i32_1 = arith.constant 0 : i32
    return %arg0, %c0_i32, %c0_i32_0 : i32, i32, i32
  }
}

</mosaic_0001>

<bundles_post_ra>
// kernel: tpu_custom_call.1
= control target key start
LH: loop header
LB: loop body
LE: loop exit
PB: predicated region body
PF: predicated region fallthrough
CT: control target
= control target key end

     0   :  { %10 = vsyncpa [#allocation3], 0  ;;  %s1033_s0 = inlined_call_operand.hbm [shape: f32[2,32,256], index: 0, kind: input, shape index: {}]   ;;  %s1034_s1 = inlined_call_operand.vmem [shape: f32[32,8], index: 1, kind: input, shape index: {}]   ;;  %s1035_s2 = inlined_call_operand.vmem [shape: f32[1,8], index: 2, kind: input, shape index: {}]   ;;  %s1036_s3 = inlined_call_operand.vmem [shape: f32[8,32], index: 3, kind: input, shape index: {}]   ;;  %s1037_s4 = inlined_call_operand.vmem [shape: f32[1,32], index: 4, kind: input, shape index: {}]   ;;  %s1038_s5 = inlined_call_operand.hbm [shape: f32[2,32,256], index: 5, kind: output, shape index: {}]  }
   0x1   :  { %12 = vsyncpa [#allocation3 + $0x1], 0 }
   0x2   :  { %13 = vsyncpa [#allocation4], 0 }
   0x3   :  { %15 = vsyncpa [#allocation4 + $0x1], 0  ;;  %s822_s18 = smov 0   ;;  %s824_s19 = smov 0  }
   0x4   :  { %s826_s20 = smov 0   ;;  %s828_s21 = smov 0  }
   0x5 LB: > { %s843_s22 = sadd.s32 4294967295, %s782_s21   ;;  %s587_s23 = sadd.s32 4294967294, %s782_s21   ;;  %s782_s21 = sphi %s828_s21, %s1053_s21   ;;  %s778_s20 = sphi %s826_s20, %s1052_s20   ;;  %s774_s19 = sphi %s824_s19, %s1051_s19   ;;  %s770_s18 = sphi %s822_s18, %s1050_s18  }
   0x6   : > { %s847_s24 = sadd.s32 1, %s782_s21   ;;  %s28_s25 = sadd.s32 1, %s778_s20 }
   0x7   : > { %s25_s26 = ssub.s32 %s782_s21, %s847_s24  ;;  %p35_p0 = scmp.ne.s32.totalorder %s778_s20, %s774_s19 }
   0x8   : > { %p26_p1 = scmp.eq.s32.totalorder %s25_s26, 0  ;;  %p36_p2 = scmp.eq.s32.totalorder %s782_s21, 0 }
   0x9   : > { %p41_p3 = scmp.ne.s32.totalorder %s774_s19, %s770_s18  ;;  %p42_p4 = scmp.eq.s32.totalorder %s843_s22, 0 }
   0xa   : > { %s859_s27 = scalar_select %p26_p1, %s778_s20, %s28_s25  }
   0xb   : > { %p861_p5 = por %p36_p2, %p35_p0  ;;  %p865_p6 = por %p42_p4, %p41_p3 }
   0xc   : > { %p149_p7 = scmp.eq.s32.totalorder %s843_s22, 1  ;;  %p155_p8 = scmp.eq.s32.totalorder %s587_s23, 1 }
   0xd   : > { %s1042_s29 = scalar_select %p865_p6, 1, 0 }
   0xe   : > { %p642_p10 = scmp.lt.s32.totalorder %s782_s21, 2  ;;  %p872_p11 = por %p149_p7, %p35_p0 }
   0xf   : > { %p876_p12 = por %p155_p8, %p41_p3  ;;  %s187_s7 = sand.u32 1, %s778_s20  }
  0x10   : > { %s1043_s30 = scalar_select %p872_p11, 1, 0 }
  0x11   : > { %s1044_s6 = scalar_select %p876_p12, 1, 0 }
  0x12   : > { %s605_s8 = sshll.u32 %s782_s21, 10  ;;  %s590_s9 = sshll.u32 %s187_s7, 6 }
  0x13   : > { %s885_s12 = scalar_lea.hbm %s1033_s0, %s605_s8  ;;  %s191_s13 = scalar_lea.vmem [#allocation2], %s590_s9 }
  0x14   : > { %s198_s14 = sshll.u32 %s191_s13, 4  ;;  %p889_p13 = pnand %p642_p10, %p861_p5  ;;  %s893_s14 = int_to_ptr.vmem [resolvable:$true] %s198_s14 }
  0x15   : > { %s895_s16 = scalar_lea.sflag [#allocation3], %s187_s7  ;;  %s690_s17 = scalar_lea.hbm %s885_s12, 1024 }
  0x16   : > { %p691_p0 = scmp.ne.s32.totalorder %s885_s12, %s690_s17  ;;  %p692_p1 = pneg %p889_p13 }
  0x17   : > { %s695_s26 = scalar_lea.hbm %s1033_s0, 2048  ;;  %p696_p4 = scmp.lt.s32.totalorder %s885_s12, %s1033_s0 }
  0x18   : > { %p693_p2 = pnand %p692_p1, %p691_p0  ;;  %p697_p5 = scmp.lt.s32.totalorder %s695_s26, %s690_s17 }
  0x1a   : > { %p694_p3 = pneg %p693_p2  ;;  %p698_p7 = por %p697_p5, %p696_p4 }
  0x1c   : > { %p699_p8 = pnand %p698_p7, %p694_p3 }
  0x1e   : > { %702 = shalt.err (!%p699_p8)
}
  0x1f   : > { %s703_s7 = scalar_lea.vmem %s893_s14, 1024  ;;  %s784_s9 = smov [#allocation2]  }
  0x20   : > { %p704_p10 = scmp.ne.s32.totalorder %s893_s14, %s703_s7  ;;  %s708_s10 = sshll.u32 %s784_s9, 4  ;;  %s709_s10 = int_to_ptr.vmem [resolvable:$false] %s708_s10 }
  0x21   : > { %s710_s11 = scalar_lea.vmem %s709_s10, 2048  ;;  %p711_p2 = scmp.lt.s32.totalorder %s893_s14, %s709_s10 }
  0x22   : > { %p706_p9 = pnand %p704_p10, %p692_p1  ;;  %p712_p12 = scmp.lt.s32.totalorder %s710_s11, %s703_s7 }
  0x24   : > { %p707_p0 = pneg %p706_p9  ;;  %p713_p11 = por %p712_p12, %p711_p2 }
  0x26   : > { %p714_p6 = pnand %p713_p11, %p707_p0 }
  0x28   : > { %717 = shalt.err (!%p714_p6)
}
  0x29   : > { %s785_s13 = smov 256   ;;  %s786_s17 = smov 16  }
  0x2a   : > { %637 = dma.hbm_to_vmem [thread:$0]  (!%p889_p13), %s885_s12, 1024, %s893_s14, %s895_s16, %s785_s13, %s785_s13, %s786_s17  }
  0x2b   : > { %p593_p9 = scmp.ge.s32.totalorder %s782_s21, 1  ;;  %p206_p1 = scmp.lt.s32.totalorder %s782_s21, 3 }
  0x2d   : > { %p207_p3 = pnand %p593_p9, %p206_p1 }
  0x2e   : > { %s919_s23 = sand.u32 (!%p207_p3), 1, %s774_s19   ;;  %p1046_p6 = scmp.ne.s32.totalorder (!%p207_p3), %s1042_s29, 0 }
  0x2f   : > { %210 = sbr.rel (%p207_p3) target bundleno = 802 (0x322), region = 40  ;;  %s594_s25 = sshll.u32 (!%p207_p3), %s919_s23, 6 }
  0x30   : > { %s213_s26 = scalar_lea.sflag (!%p207_p3), [#allocation3], %s919_s23  ;;  %s216_s28 = scalar_lea.vmem (!%p207_p3), [#allocation2], %s594_s25 }
  0x34   : > { %761 = dma.done.wait (%p1046_p6), %s213_s26, 1024  }
  0x35   : > { %763 = vsyncadd (%p1046_p6), %s213_s26, 4294966272  ;;  %v929_v0 = vld [vmem:[%s216_s28] sm:$0xff]  ;;  %v931_v1 = vld [vmem:[%s216_s28 + $0x8] sm:$0xff]  ;;  %v787_v12 = vmov 0.0   ;;  %vm788_vm0 = vmmov 0   ;;  %v276_v17 = vlaneseq  ;;  %vm287_vm1 = vcmask 130112  }
  0x36   : > { %v933_v2 = vld [vmem:[%s216_s28 + $0x20] sm:$0xff]  ;;  %v251_v3 = vadd.f32 %v931_v1, %v929_v0  ;;  %v937_v4 = vld [vmem:[%s216_s28 + $0x28] sm:$0xff]  ;;  %v939_v5 = vld [vmem:[%s216_s28 + $0x10] sm:$0xff]  ;;  %614 = vmatprep.subr.mxu0 %v787_v12  ;;  %625 = vmatprep.subr.mxu1 %v787_v12  ;;  %vm294_vm2 = vcmask 195712   ;;  %vm301_vm3 = vcmask 261312   ;;  %vm303_vm4 = vcmask 261120  }
  0x37   : > { %v941_v6 = vld [vmem:[%s216_s28 + $0x18] sm:$0xff]  ;;  %v257_v7 = vadd.f32 %v937_v4, %v933_v2  ;;  %v945_v8 = vld [vmem:[%s216_s28 + $0x30] sm:$0xff]  ;;  %v268_v15 = vld [vmem:[%s1034_s1 + $0x8] sm:$0xff]  ;;  %622 = vmatprep.mubr.msk.f32.mxu0 %vm788_vm0, %v787_v12  ;;  %627 = vmatprep.mubr.msk.f32.mxu1 %vm788_vm0, %v787_v12  ;;  %v277_v18 = vand.u32 127, %v276_v17  ;;  %v279_v19 = vshrl.u32 %v276_v17, 7  ;;  %vm385_vm5 = vcmask 64512  }
  0x38   : > { %v947_v9 = vld [vmem:[%s216_s28 + $0x38] sm:$0xff]  ;;  %252 = vadd.xlane.f32.xlu0 %v251_v3  ;;  %v254_v10 = vadd.f32 %v941_v6, %v939_v5  ;;  %v269_v14 = vld [vmem:[%s1034_s1 + $0x10] sm:$0xff]  ;;  %v267_v16 = vld [vmem:[%s1034_s1] sm:$0xff]  ;;  %s242_s29 = scalar_lea.vmem [#allocation5], %s594_s25  ;;  %s606_s14 = sshll.u32 %s843_s22, 10 }
  0x39   : > { %258 = vadd.xlane.f32.xlu1 %v257_v7  ;;  %v260_v11 = vadd.f32 %v947_v9, %v945_v8  ;;  %v270_v13 = vld [vmem:[%s1034_s1 + $0x18] sm:$0xff]  ;;  %v282_v20 = vadd.s32 4294967288, %v277_v18  ;;  %v289_v22 = vadd.s32 4294967280, %v277_v18  ;;  %v296_v23 = vadd.s32 4294967272, %v277_v18  ;;  %v383_v42 = vld [vmem:[%s1036_s3] sm:$0xff]  ;;  %s514_s12 = sshll.u32 %s242_s29, 4  ;;  %s988_s16 = scalar_lea.hbm %s1038_s5, %s606_s14  ;;  %s983_s12 = int_to_ptr.vmem [resolvable:$true] %s514_s12 }
  0x3a   : > { %615 = vmatpush3.msra.mxu0 %v270_v13  ;;  %v280_v25 = vsub.s32 %v277_v18, %v279_v19  ;;  %626 = vmatpush3.msra.mxu1 %v383_v42  ;;  %v271_v43 = vld [vmem:[%s1035_s2] sm:$0x1]  ;;  %v467_v59 = vsub.s32 0, %v279_v19  ;;  %s501_s22 = scalar_lea.sflag [#allocation4], %s919_s23  ;;  %s718_s8 = scalar_lea.vmem %s983_s12, 1024 }
  0x3b   : > { %616 = vmatprep.subr.mxu0 %v787_v12  ;;  %v285_v27 = vsub.s32 %v282_v20, %v279_v19  ;;  %v292_v28 = vsub.s32 %v289_v22, %v279_v19  ;;  %v299_v31 = vsub.s32 %v296_v23, %v279_v19  ;;  %v384_v52 = vld [vmem:[%s1037_s4] sm:$0x1]  ;;  %p719_p11 = scmp.ne.s32.totalorder %s983_s12, %s718_s8  ;;  %p1047_p12 = scmp.ne.s32.totalorder %s1043_s30, 0 }
  0x3c   : > { %255 = vadd.xlane.f32.xlu0 %v254_v10  ;;  %617 = vmatpush3.msra.mxu0 %v269_v14  ;;  %s789_s7 = smov [#allocation5]  }
  0x3d   : > { %261 = vadd.xlane.f32.xlu1 %v260_v11  ;;  %618 = vmatprep.subr.mxu0 %v787_v12  ;;  %p720_p13 = pnand %p719_p11, %p1047_p12  ;;  %s722_s9 = sshll.u32 %s789_s7, 4  ;;  %s723_s9 = int_to_ptr.vmem [resolvable:$false] %s722_s9 }
  0x3e   : > { %619 = vmatpush3.msra.mxu0 %v268_v15  ;;  %s724_s10 = scalar_lea.vmem %s723_s9, 2048  ;;  %p725_p5 = scmp.lt.s32.totalorder %s983_s12, %s723_s9 }
  0x3f   : > { %620 = vmatprep.subr.mxu0 %v787_v12  ;;  %p721_p4 = pneg %p720_p13  ;;  %p726_p7 = scmp.lt.s32.totalorder %s724_s10, %s718_s8 }
  0x40   : > { %621 = vmatpush3.msra.mxu0 %v267_v16 }
  0x41   : > { %p727_p8 = por %p726_p7, %p725_p5 }
  0x43   : > { %p728_p10 = pnand %p727_p8, %p721_p4 }
  0xc1   : > { %v253_v21 = vpop.xlane.xlu0 %252 }
  0xc2   : > { %v259_v24 = vpop.xlane.xlu1 %258  ;;  %v263_v26 = vmul.f32 0.00390625, %v253_v21 }
  0xc3   : > { %v265_v29 = vmul.f32 0.00390625, %v259_v24 }
  0xc4   : > { %v281_v35 = vrot.slane %v263_v26, %v280_v25 }
  0xc5   : > { %v256_v30 = vpop.xlane.xlu0 %255  ;;  %v293_v37 = vrot.slane %v265_v29, %v292_v28 }
  0xc6   : > { %v264_v32 = vmul.f32 0.00390625, %v256_v30  ;;  %v262_v33 = vpop.xlane.xlu1 %261 }
  0xc7   : > { %v266_v34 = vmul.f32 0.00390625, %v262_v33 }
  0xc8   : > { %v286_v36 = vrot.slane %v264_v32, %v285_v27 }
  0xc9   : > { %v300_v38 = vrot.slane %v266_v34, %v299_v31 }
  0xca   : > { %v288_v39 = vsel %vm287_vm1, %v286_v36, %v281_v35 }
  0xcb   : > { %v295_v40 = vsel %vm294_vm2, %v293_v37, %v288_v39 }
  0xcc   : > { %v302_v41 = vsel %vm301_vm3, %v300_v38, %v295_v40 }
  0xcd   : > { %623 = vmatmul.mubr.msk.f32.vlgmr.msra.gmra.mxu0 %vm303_vm4, %v302_v41 }
 0x18d   : > { %v372_v44 = vpop.f32.mrf.mxu0 }
 0x18e   : > { %v373_v45 = vadd.f32 %v372_v44, %v271_v43 }
 0x18f   : > { %v624_v46 = vpop.f32.mrf.mxu0 }
 0x190   : > { %v597_v47 = vmul.f32 -1.442695, %v373_v45 }
 0x192   : > { %682 = vpow2.f32 %v597_v47 }
 0x19f   : > { %v683_v48 = vpop.eup %682 }
 0x1a0   : > { %v379_v49 = vadd.f32 1.0, %v683_v48 }
 0x1a2   : > { %684 = vrcp.f32 %v379_v49 }
 0x1af   : > { %v685_v50 = vpop.eup %684 }
 0x1b0   : > { %v382_v51 = vmul.f32 %v685_v50, %v373_v45 }
 0x1b2   : > { %628 = vmatmul.mubr.msk.f32.vlgmr.msra.gmra.mxu1 %vm385_vm5, %v382_v51 }
 0x272   : > { %v455_v53 = vpop.f32.mrf.mxu1 }
 0x273   : > { %v456_v54 = vadd.f32 %v455_v53, %v384_v52 }
 0x274   : > { %v629_v55 = vpop.f32.mrf.mxu1 }
 0x275   : > { %v599_v56 = vmul.f32 -1.442695, %v456_v54 }
 0x277   : > { %686 = vpow2.f32 %v599_v56 }
 0x284   : > { %v687_v57 = vpop.eup %686 }
 0x285   : > { %v462_v58 = vadd.f32 1.0, %v687_v57 }
 0x287   : > { %688 = vrcp.f32 %v462_v58 }
 0x294   : > { %v689_v60 = vpop.eup %688 }
 0x295   : > { %v468_v61 = vrot.slane %v689_v60, %v467_v59 }
 0x297   : > { %474 = vbcast.lane.b32.xlu1 %v468_v61, 264  ;;  %470 = vbcast.lane.b32.xlu0 %v468_v61, 256 }
 0x29b   : > { %478 = vbcast.lane.b32.xlu1 %v468_v61, 272 }
 0x29f   : > { %482 = vbcast.lane.b32.xlu1 %v468_v61, 280 }
 0x309   : > { %v475_v62 = vpop.permute.xlu1 %474  ;;  %v471_v63 = vpop.permute.xlu0 %470 }
 0x30a   : > { %v486_v3 = vmul.f32 %v475_v62, %v939_v5  ;;  %v487_v7 = vmul.f32 %v475_v62, %v941_v6  ;;  %v484_v10 = vmul.f32 %v471_v63, %v929_v0  ;;  %v485_v11 = vmul.f32 %v471_v63, %v931_v1 }
 0x30c   : > { %494 = vst [vmem:[%s242_s29 + $0x10] sm:$0xff] %v486_v3  ;;  %495 = vst [vmem:[%s242_s29 + $0x18] sm:$0xff] %v487_v7 }
 0x30d   : > { %492 = vst [vmem:[%s242_s29] sm:$0xff] %v484_v10  ;;  %493 = vst [vmem:[%s242_s29 + $0x8] sm:$0xff] %v485_v11  ;;  %v479_v12 = vpop.permute.xlu1 %478 }
 0x30e   : > { %v488_v13 = vmul.f32 %v479_v12, %v933_v2  ;;  %v489_v5 = vmul.f32 %v479_v12, %v937_v4 }
 0x310   : > { %496 = vst [vmem:[%s242_s29 + $0x20] sm:$0xff] %v488_v13  ;;  %497 = vst [vmem:[%s242_s29 + $0x28] sm:$0xff] %v489_v5 }
 0x311   : > { %v483_v0 = vpop.permute.xlu1 %482 }
 0x312   : > { %v490_v1 = vmul.f32 %v483_v0, %v945_v8  ;;  %v491_v2 = vmul.f32 %v483_v0, %v947_v9 }
 0x314   : > { %498 = vst [vmem:[%s242_s29 + $0x30] sm:$0xff] %v490_v1  ;;  %499 = vst [vmem:[%s242_s29 + $0x38] sm:$0xff] %v491_v2 }
 0x315   : > { %731 = shalt.err (!%p728_p10)
}
 0x316   : > { %s732_s11 = scalar_lea.hbm %s988_s16, 1024  ;;  %s736_s26 = scalar_lea.hbm %s1038_s5, 2048 }
 0x317   : > { %p733_p0 = scmp.ne.s32.totalorder %s988_s16, %s732_s11  ;;  %p737_p1 = scmp.lt.s32.totalorder %s988_s16, %s1038_s5 }
 0x318   : > { %p738_p3 = scmp.lt.s32.totalorder %s736_s26, %s732_s11 }
 0x319   : > { %p734_p2 = pnand %p733_p0, %p1047_p12 }
 0x31a   : > { %p739_p6 = por %p738_p3, %p737_p1 }
 0x31b   : > { %p735_p9 = pneg %p734_p2 }
 0x31d   : > { %p740_p11 = pnand %p739_p6, %p735_p9 }
 0x31f   : > { %743 = shalt.err (!%p740_p11)
}
 0x320   : > { %s790_s14 = smov 256   ;;  %s791_s25 = smov 16  }
 0x321   : > { %632 = dma.vmem_to_hbm [thread:$0]  (%p1047_p12), %s983_s12, 1024, %s988_s16, %s501_s22, %s790_s14, %s790_s14, %s791_s25  }
 0x322 PF: > { %s529_s15 = sand.u32 1, %s770_s18   ;;  %p1048_p13 = scmp.ne.s32.totalorder %s1044_s6, 0 }
 0x323   : > { %p1049_p4 = scmp.ge.s32.totalorder %s782_s21, 2  ;;  %s530_s8 = scalar_lea.sflag [#allocation4], %s529_s15 }
 0x325   : > { %p639_p5 = pnand %p1049_p4, %p1048_p13 }
 0x327   : > { %p640_p7 = pneg %p639_p5 }
 0x329   : > { %765 = dma.done.wait (%p640_p7), %s530_s8, 1024  }
 0x32a   : > { %767 = vsyncadd (%p640_p7), %s530_s8, 4294966272  ;;  %p18_p8 = scmp.ge.s32.totalorder %s847_s24, 4   ;;  %s1050_s18 = smov %s774_s19 }
 0x32b   : > { %s1051_s19 = smov %s778_s20  ;;  %s1052_s20 = smov %s859_s27 }
 0x32c   : > { %s1053_s21 = smov %s847_s24  ;;  %20 = sbr.rel (!%p18_p8) target bundleno = 5 (0x5), region = 85 }
 0x331   :  { %535 = vsyncpa [#allocation3], 1 }
 0x332   :  { %537 = vsyncpa [#allocation3 + $0x1], 1 }
 0x333   :  { %538 = vsyncpa [#allocation4], 1 }
 0x334   :  { %540 = vsyncpa [#allocation4 + $0x1], 1 }

</bundles_post_ra>
